<compile_context>
chip_gen: v6e
topology: v6e:2x2x1
jax: 0.10.0
libtpu: 0.0.40
codegen_flags: <defaults>
</compile_context>

<pallas_src>
import jax
import jax.numpy as jnp
from jax.experimental import pallas as pl
from jax.experimental.pallas import tpu as pltpu

MAX_BLOCK_ELEMS = 512 * 1024   # ~2 MiB of f32 work per input block


def _round_up(a, b):
    return ((a + b - 1) // b) * b


def _round_down(a, b):
    return (a // b) * b


def _device_kind():
    try:
        return jax.devices()[0].device_kind.lower()
    except Exception:  # defensive: never fail planning on an odd backend
        return ""


def _num_tensorcores(kind):
    # Only v7x exposes 2 TensorCores to a single Pallas kernel; v5e/v6e have 1.
    return 2 if "v7" in kind else 1


def _row_align(dtype):
    itemsize = jnp.dtype(dtype).itemsize
    if itemsize >= 4:
        return 8
    if itemsize == 2:
        return 16
    return 32


def _pick_lanes(n, row_align):
    """Largest lane width in {512,256,128} dividing n (prefer >= row_align rows)."""
    best = None
    for lanes in (512, 256, 128):
        if n % lanes == 0:
            if best is None:
                best = lanes
            if n // lanes >= row_align:
                return lanes
    return best


def _plan(n_rows, row_align, lanes, kind):
    """Tiling plan: (num_cores, steps_per_core, tile_rows, main_rows) or None."""
    if n_rows < row_align:
        return None
    max_tile_rows = _round_down(MAX_BLOCK_ELEMS // lanes, row_align)
    num_cores = _num_tensorcores(kind)
    if _round_down(n_rows // num_cores, row_align) == 0:
        num_cores = 1
    rows_per_core = _round_down(n_rows // num_cores, row_align)
    steps_per_core = max(1, -(-rows_per_core // max_tile_rows))      # ceil
    tile_rows = _round_down(rows_per_core // steps_per_core, row_align)
    main_rows = num_cores * steps_per_core * tile_rows
    return num_cores, steps_per_core, tile_rows, main_rows


def _dice_bce_kernel(x_ref, t_ref, out_ref, acc_xt, acc_xpt, acc_bce):
    j = pl.program_id(1)

    @pl.when(j == 0)
    def _init():
        acc_xt[...] = jnp.zeros_like(acc_xt)
        acc_xpt[...] = jnp.zeros_like(acc_xpt)
        acc_bce[...] = jnp.zeros_like(acc_bce)

    x = x_ref[...].astype(jnp.float32)
    t = t_ref[...].astype(jnp.float32)

    # Per-element BCE with PyTorch's log clamp at -100 (two-log form stays
    # exact for soft / non-binary targets).
    log_x = jnp.maximum(jnp.log(x), -100.0)
    log_1mx = jnp.maximum(jnp.log(1.0 - x), -100.0)
    bce = -(t * (log_x - log_1mx) + log_1mx)

    tile_rows, lanes = x_ref.shape
    groups = tile_rows // 8

    def fold(v):
        # Layout-free in-vreg reduction (8-row groups match native (8,128)
        # tiling): (tile_rows, lanes) -> (8, lanes), pure VALU.
        return jnp.sum(v.reshape(groups, 8, lanes), axis=0)

    acc_xt[...] += fold(x * t)
    acc_xpt[...] += fold(x + t)
    acc_bce[...] += fold(bce)

    @pl.when(j == pl.num_programs(1) - 1)
    def _finalize():
        s_xt = jnp.sum(acc_xt[...])
        s_xpt = jnp.sum(acc_xpt[...])
        s_bce = jnp.sum(acc_bce[...])
        row = jax.lax.broadcasted_iota(jnp.int32, (1, 8, 128), 1)
        out_ref[...] = jnp.where(row == 0, s_xt,
                       jnp.where(row == 1, s_xpt, s_bce))


def _partial_sums_jax(x, t):
    """Plain-JAX partial sums [sum(x*t), sum(x+t), sum(bce)] for tails / tiny inputs."""
    x = x.astype(jnp.float32)
    t = t.astype(jnp.float32)
    log_x = jnp.maximum(jnp.log(x), -100.0)
    log_1mx = jnp.maximum(jnp.log(1.0 - x), -100.0)
    bce = -(t * (log_x - log_1mx) + log_1mx)
    return jnp.stack([jnp.sum(x * t), jnp.sum(x + t), jnp.sum(bce)])


def dice_bce_loss(inputs, targets, smooth=1.0):
    """DiceBCELoss.forward(inputs, targets, smooth) -> scalar f32."""
    assert inputs.shape == targets.shape
    n = int(inputs.size)
    smooth = jnp.float32(smooth)
    kind = _device_kind()
    row_align = _row_align(inputs.dtype)

    x_flat = inputs.reshape(-1)     # free view of a contiguous buffer
    t_flat = targets.reshape(-1)

    lanes = _pick_lanes(n, row_align)
    if lanes is None:
        # Rare path: n not a multiple of 128.  Pad the flat stream with zeros
        # (zeros contribute exactly 0 to every partial sum).  Only this case
        # pays an extra HBM copy; 128-aligned inputs never do.
        lanes = 128
        n_padded = _round_up(n, lanes * row_align)
        x_flat = jnp.pad(x_flat, (0, n_padded - n))
        t_flat = jnp.pad(t_flat, (0, n_padded - n))
    n_rows = x_flat.size // lanes

    plan = _plan(n_rows, row_align, lanes, kind)
    if plan is None:
        # Tiny input: not worth a kernel launch.
        sums = _partial_sums_jax(x_flat, t_flat)
    else:
        num_cores, steps_per_core, tile_rows, main_rows = plan
        x2 = x_flat.reshape(n_rows, lanes)    # free view (size == n_rows*lanes)
        t2 = t_flat.reshape(n_rows, lanes)

        in_kwargs = {}
        if "v7" in kind:
            # Deeper input pipeline smooths DMA jitter behind the very short
            # per-block compute on v7x's ~1.6 TB/s per-TC HBM stream.
            in_kwargs["pipeline_mode"] = pl.Buffered(3)
        in_spec = pl.BlockSpec(
            (tile_rows, lanes),
            lambda pi, ji, s=steps_per_core: (pi * s + ji, 0),
            **in_kwargs,
        )

        itemsize = jnp.dtype(inputs.dtype).itemsize
        main_elems = main_rows * lanes
        cost = pl.CostEstimate(
            flops=10 * main_elems,
            transcendentals=2 * main_elems,
            bytes_accessed=2 * main_elems * itemsize + num_cores * 8 * 128 * 4,
        )

        parts = pl.pallas_call(
            _dice_bce_kernel,
            out_shape=jax.ShapeDtypeStruct((num_cores, 8, 128), jnp.float32),
            grid_spec=pltpu.PrefetchScalarGridSpec(
                num_scalar_prefetch=0,
                grid=(num_cores, steps_per_core),
                in_specs=[in_spec, in_spec],
                out_specs=pl.BlockSpec((1, 8, 128), lambda pi, ji: (pi, 0, 0)),
                scratch_shapes=[
                    pltpu.VMEM((8, lanes), jnp.float32) for _ in range(3)
                ],
            ),
            compiler_params=pltpu.CompilerParams(
                dimension_semantics=("parallel", "arbitrary"),
                # v7x has 64 MiB VMEM per TensorCore; v5e/v6e have 128 MiB.
                vmem_limit_bytes=(32 << 20) if "v7" in kind else (64 << 20),
            ),
            cost_estimate=cost,
        )(x2, t2)

        sums = jnp.sum(parts[:, :3, 0], axis=0)
        if main_rows < n_rows:
            # Ragged row tail (< one core-unit of rows): plain JAX on just the
            # tail slice; the main stream is never copied or padded.
            sums = sums + _partial_sums_jax(x2[main_rows:], t2[main_rows:])

    s_xt, s_xpt, s_bce = sums[0], sums[1], sums[2]
    dice_loss = 1.0 - (2.0 * s_xt + smooth) / (s_xpt + smooth)
    bce_mean = s_bce / jnp.float32(n)
    return bce_mean + dice_loss


if __name__ == "__main__":
    key = jax.random.PRNGKey(0)
    k1, k2, k3, k4 = jax.random.split(key, 4)

    def reference(inputs, targets, smooth=1.0):
        x = inputs.astype(jnp.float32)
        t = targets.astype(jnp.float32)
        inter = jnp.sum(x * t)
        dice = 1.0 - (2.0 * inter + smooth) / (jnp.sum(x) + jnp.sum(t) + smooth)
        bce = jnp.mean(-(t * jnp.maximum(jnp.log(x), -100.0)
                         + (1.0 - t) * jnp.maximum(jnp.log(1.0 - x), -100.0)))
        return bce + dice

    # Small NCHW example consistent with a segmentation loss.
    B, C, H, W = 2, 4, 16, 16
    inputs = jax.nn.sigmoid(jax.random.normal(k1, (B, C, H, W), jnp.float32))
    targets = (jax.random.uniform(k2, (B, C, H, W)) > 0.5).astype(jnp.float32)
    loss = dice_bce_loss(inputs, targets, smooth=1)
    jax.block_until_ready(loss)
    ref = reference(inputs, targets, 1.0)
    assert jnp.allclose(loss, ref, rtol=1e-5, atol=1e-5), (loss, ref)

    # Second shape exercising the multi-row plan + ragged row tail
    # (21 * 512 elements -> 16 kernel rows + 5 tail rows in plain JAX).
    shape2 = (3, 7, 16, 32)
    inputs2 = jax.nn.sigmoid(jax.random.normal(k3, shape2, jnp.float32))
    targets2 = (jax.random.uniform(k4, shape2) > 0.5).astype(jnp.float32)
    loss2 = dice_bce_loss(inputs2, targets2, smooth=1)
    jax.block_until_ready(loss2)
    ref2 = reference(inputs2, targets2, 1.0)
    assert jnp.allclose(loss2, ref2, rtol=1e-5, atol=1e-5), (loss2, ref2)

    print("KERNEL_OK")
</pallas_src>

<mosaic_0001>
module attributes {stable_mosaic.version = 11 : i64} {
  func.func @_dice_bce_kernel(%arg0: i32, %arg1: i32, %arg2: memref<8x256xf32, #tpu.memory_space<vmem>>, %arg3: memref<8x256xf32, #tpu.memory_space<vmem>>, %arg4: memref<1x8x128xf32, #tpu.memory_space<vmem>>, %arg5: memref<8x256xf32, #tpu.memory_space<vmem>>, %arg6: memref<8x256xf32, #tpu.memory_space<vmem>>, %arg7: memref<8x256xf32, #tpu.memory_space<vmem>>) attributes {dimension_semantics = [#tpu.dimension_semantics<parallel>, #tpu.dimension_semantics<arbitrary>], iteration_bounds = array<i64: 1, 1>, scalar_prefetch = 0 : i64, scratch_operands = 3 : i64, tpu.core_type = #tpu.core_type<tc>, window_params = [{transform_indices = @transform_0, window_bounds = array<i64: 8, 256>}, {transform_indices = @transform_1, window_bounds = array<i64: 8, 256>}, {transform_indices = @transform_2, window_bounds = array<i64: 1, 8, 128>}]} {
    %c0_i32 = arith.constant 0 : i32
    %0 = arith.cmpi eq, %arg1, %c0_i32 : i32
    %1 = arith.extui %0 : i1 to i32
    %c0_i32_0 = arith.constant 0 : i32
    %2 = arith.cmpi ne, %1, %c0_i32_0 : i32
    scf.if %2 {
      %cst_24 = arith.constant 0.000000e+00 : f32
      %38 = vector.broadcast %cst_24 : f32 to vector<8x256xf32>
      %c0_25 = arith.constant 0 : index
      %c0_26 = arith.constant 0 : index
      %39 = vector.load %arg5[%c0_25, %c0_26] : memref<8x256xf32, #tpu.memory_space<vmem>>, vector<8x256xf32>
      tpu.vector_store %arg5[%c0_25, %c0_26], %38 {strides = array<i32>} : memref<8x256xf32, #tpu.memory_space<vmem>>, vector<8x256xf32>,
      %cst_27 = arith.constant 0.000000e+00 : f32
      %40 = vector.broadcast %cst_27 : f32 to vector<8x256xf32>
      %c0_28 = arith.constant 0 : index
      %c0_29 = arith.constant 0 : index
      %41 = vector.load %arg6[%c0_28, %c0_29] : memref<8x256xf32, #tpu.memory_space<vmem>>, vector<8x256xf32>
      tpu.vector_store %arg6[%c0_28, %c0_29], %40 {strides = array<i32>} : memref<8x256xf32, #tpu.memory_space<vmem>>, vector<8x256xf32>,
      %cst_30 = arith.constant 0.000000e+00 : f32
      %42 = vector.broadcast %cst_30 : f32 to vector<8x256xf32>
      %c0_31 = arith.constant 0 : index
      %c0_32 = arith.constant 0 : index
      %43 = vector.load %arg7[%c0_31, %c0_32] : memref<8x256xf32, #tpu.memory_space<vmem>>, vector<8x256xf32>
      tpu.vector_store %arg7[%c0_31, %c0_32], %42 {strides = array<i32>} : memref<8x256xf32, #tpu.memory_space<vmem>>, vector<8x256xf32>,
    } else {
    }
    %c0 = arith.constant 0 : index
    %c0_1 = arith.constant 0 : index
    %3 = vector.load %arg2[%c0, %c0_1] : memref<8x256xf32, #tpu.memory_space<vmem>>, vector<8x256xf32>
    %c0_2 = arith.constant 0 : index
    %c0_3 = arith.constant 0 : index
    %4 = vector.load %arg3[%c0_2, %c0_3] : memref<8x256xf32, #tpu.memory_space<vmem>>, vector<8x256xf32>
    %5 = math.log %3 : vector<8x256xf32>
    %cst = arith.constant -1.000000e+02 : f32
    %6 = vector.broadcast %cst : f32 to vector<8x256xf32>
    %7 = arith.maximumf %5, %6 : vector<8x256xf32>
    %cst_4 = arith.constant 1.000000e+00 : f32
    %8 = vector.broadcast %cst_4 : f32 to vector<8x256xf32>
    %9 = arith.subf %8, %3 : vector<8x256xf32>
    %10 = math.log %9 : vector<8x256xf32>
    %cst_5 = arith.constant -1.000000e+02 : f32
    %11 = vector.broadcast %cst_5 : f32 to vector<8x256xf32>
    %12 = arith.maximumf %10, %11 : vector<8x256xf32>
    %13 = arith.subf %7, %12 : vector<8x256xf32>
    %14 = arith.mulf %4, %13 : vector<8x256xf32>
    %15 = arith.addf %14, %12 : vector<8x256xf32>
    %cst_6 = arith.constant 0.000000e+00 : f32
    %16 = vector.broadcast %cst_6 : f32 to vector<8x256xf32>
    %17 = arith.subf %16, %15 : vector<8x256xf32>
    %c0_7 = arith.constant 0 : index
    %c0_8 = arith.constant 0 : index
    %18 = vector.load %arg5[%c0_7, %c0_8] : memref<8x256xf32, #tpu.memory_space<vmem>>, vector<8x256xf32>
    %19 = arith.mulf %3, %4 : vector<8x256xf32>
    %20 = vector.shape_cast %19 : vector<8x256xf32> to vector<1x8x256xf32>
    %cst_9 = arith.constant dense<0.000000e+00> : vector<8x256xf32>
    %21 = vector.multi_reduction <add>, %20, %cst_9 [0] : vector<1x8x256xf32> to vector<8x256xf32>
    %22 = arith.addf %18, %21 : vector<8x256xf32>
    %c0_10 = arith.constant 0 : index
    %c0_11 = arith.constant 0 : index
    %23 = vector.load %arg5[%c0_10, %c0_11] : memref<8x256xf32, #tpu.memory_space<vmem>>, vector<8x256xf32>
    tpu.vector_store %arg5[%c0_10, %c0_11], %22 {strides = array<i32>} : memref<8x256xf32, #tpu.memory_space<vmem>>, vector<8x256xf32>,
    %c0_12 = arith.constant 0 : index
    %c0_13 = arith.constant 0 : index
    %24 = vector.load %arg6[%c0_12, %c0_13] : memref<8x256xf32, #tpu.memory_space<vmem>>, vector<8x256xf32>
    %25 = arith.addf %3, %4 : vector<8x256xf32>
    %26 = vector.shape_cast %25 : vector<8x256xf32> to vector<1x8x256xf32>
    %cst_14 = arith.constant dense<0.000000e+00> : vector<8x256xf32>
    %27 = vector.multi_reduction <add>, %26, %cst_14 [0] : vector<1x8x256xf32> to vector<8x256xf32>
    %28 = arith.addf %24, %27 : vector<8x256xf32>
    %c0_15 = arith.constant 0 : index
    %c0_16 = arith.constant 0 : index
    %29 = vector.load %arg6[%c0_15, %c0_16] : memref<8x256xf32, #tpu.memory_space<vmem>>, vector<8x256xf32>
    tpu.vector_store %arg6[%c0_15, %c0_16], %28 {strides = array<i32>} : memref<8x256xf32, #tpu.memory_space<vmem>>, vector<8x256xf32>,
    %c0_17 = arith.constant 0 : index
    %c0_18 = arith.constant 0 : index
    %30 = vector.load %arg7[%c0_17, %c0_18] : memref<8x256xf32, #tpu.memory_space<vmem>>, vector<8x256xf32>
    %31 = vector.shape_cast %17 : vector<8x256xf32> to vector<1x8x256xf32>
    %cst_19 = arith.constant dense<0.000000e+00> : vector<8x256xf32>
    %32 = vector.multi_reduction <add>, %31, %cst_19 [0] : vector<1x8x256xf32> to vector<8x256xf32>
    %33 = arith.addf %30, %32 : vector<8x256xf32>
    %c0_20 = arith.constant 0 : index
    %c0_21 = arith.constant 0 : index
    %34 = vector.load %arg7[%c0_20, %c0_21] : memref<8x256xf32, #tpu.memory_space<vmem>>, vector<8x256xf32>
    tpu.vector_store %arg7[%c0_20, %c0_21], %33 {strides = array<i32>} : memref<8x256xf32, #tpu.memory_space<vmem>>, vector<8x256xf32>,
    %c0_i32_22 = arith.constant 0 : i32
    %35 = arith.cmpi eq, %arg1, %c0_i32_22 : i32
    %36 = arith.extui %35 : i1 to i32
    %c0_i32_23 = arith.constant 0 : i32
    %37 = arith.cmpi ne, %36, %c0_i32_23 : i32
    scf.if %37 {
      %c0_24 = arith.constant 0 : index
      %c0_25 = arith.constant 0 : index
      %38 = vector.load %arg5[%c0_24, %c0_25] : memref<8x256xf32, #tpu.memory_space<vmem>>, vector<8x256xf32>
      %39 = vector.shape_cast %38 : vector<8x256xf32> to vector<1x8x256xf32>
      %cst_26 = arith.constant dense<0.000000e+00> : vector<1xf32>
      %40 = vector.multi_reduction <add>, %39, %cst_26 [1, 2] : vector<1x8x256xf32> to vector<1xf32>
      %41 = vector.shape_cast %40 : vector<1xf32> to vector<1x1x1xf32>
      %42 = vector.extract %41[0, 0, 0] : f32 from vector<1x1x1xf32>
      %c0_27 = arith.constant 0 : index
      %c0_28 = arith.constant 0 : index
      %43 = vector.load %arg6[%c0_27, %c0_28] : memref<8x256xf32, #tpu.memory_space<vmem>>, vector<8x256xf32>
      %44 = vector.shape_cast %43 : vector<8x256xf32> to vector<1x8x256xf32>
      %cst_29 = arith.constant dense<0.000000e+00> : vector<1xf32>
      %45 = vector.multi_reduction <add>, %44, %cst_29 [1, 2] : vector<1x8x256xf32> to vector<1xf32>
      %46 = vector.shape_cast %45 : vector<1xf32> to vector<1x1x1xf32>
      %47 = vector.extract %46[0, 0, 0] : f32 from vector<1x1x1xf32>
      %c0_30 = arith.constant 0 : index
      %c0_31 = arith.constant 0 : index
      %48 = vector.load %arg7[%c0_30, %c0_31] : memref<8x256xf32, #tpu.memory_space<vmem>>, vector<8x256xf32>
      %49 = vector.shape_cast %48 : vector<8x256xf32> to vector<1x8x256xf32>
      %cst_32 = arith.constant dense<0.000000e+00> : vector<1xf32>
      %50 = vector.multi_reduction <add>, %49, %cst_32 [1, 2] : vector<1x8x256xf32> to vector<1xf32>
      %51 = vector.shape_cast %50 : vector<1xf32> to vector<1x1x1xf32>
      %52 = vector.extract %51[0, 0, 0] : f32 from vector<1x1x1xf32>
      %53 = tpu.iota {dimensions = array<i32: 1>} : vector<1x8x128xi32>
      %c0_i32_33 = arith.constant 0 : i32
      %54 = vector.broadcast %c0_i32_33 : i32 to vector<1x8x128xi32>
      %55 = arith.cmpi eq, %53, %54 : vector<1x8x128xi32>
      %c1_i32 = arith.constant 1 : i32
      %56 = vector.broadcast %c1_i32 : i32 to vector<1x8x128xi32>
      %57 = arith.cmpi eq, %53, %56 : vector<1x8x128xi32>
      %58 = vector.broadcast %47 : f32 to vector<1x8x128xf32>
      %59 = vector.broadcast %52 : f32 to vector<1x8x128xf32>
      %60 = arith.select %57, %58, %59 : vector<1x8x128xi1>, vector<1x8x128xf32>
      %61 = vector.broadcast %42 : f32 to vector<1x8x128xf32>
      %62 = arith.select %55, %61, %60 : vector<1x8x128xi1>, vector<1x8x128xf32>
      %c0_34 = arith.constant 0 : index
      %c0_35 = arith.constant 0 : index
      %c0_36 = arith.constant 0 : index
      %63 = vector.load %arg4[%c0_34, %c0_35, %c0_36] : memref<1x8x128xf32, #tpu.memory_space<vmem>>, vector<1x8x128xf32>
      tpu.vector_store %arg4[%c0_34, %c0_35, %c0_36], %62 {strides = array<i32>} : memref<1x8x128xf32, #tpu.memory_space<vmem>>, vector<1x8x128xf32>,
    } else {
    }
    return
  }
  func.func @transform_0(%arg0: i32, %arg1: i32) -> (i32, i32) {
    %c1_i32 = arith.constant 1 : i32
    %0 = arith.muli %arg0, %c1_i32 : i32
    %1 = arith.addi %0, %arg1 : i32
    %c0_i32 = arith.constant 0 : i32
    %c0_i32_0 = arith.constant 0 : i32
    return %1, %c0_i32 : i32, i32
  }
  func.func @transform_1(%arg0: i32, %arg1: i32) -> (i32, i32) {
    %c1_i32 = arith.constant 1 : i32
    %0 = arith.muli %arg0, %c1_i32 : i32
    %1 = arith.addi %0, %arg1 : i32
    %c0_i32 = arith.constant 0 : i32
    %c0_i32_0 = arith.constant 0 : i32
    return %1, %c0_i32 : i32, i32
  }
  func.func @transform_2(%arg0: i32, %arg1: i32) -> (i32, i32, i32) {
    %c0_i32 = arith.constant 0 : i32
    %c0_i32_0 = arith.constant 0 : i32
    %c0_i32_1 = arith.constant 0 : i32
    return %arg0, %c0_i32, %c0_i32_0 : i32, i32, i32
  }
}

</mosaic_0001>

<bundles_post_ra>
// kernel: tpu_custom_call.1
= control target key start
LH: loop header
LB: loop body
LE: loop exit
PB: predicated region body
PF: predicated region fallthrough
CT: control target
= control target key end

     0   :  { %7 = vsyncpa [#allocation6], 0  ;;  %s285_s0 = inlined_call_operand.hbm [shape: f32[8,256], index: 0, kind: input, shape index: {}]   ;;  %s286_s1 = inlined_call_operand.hbm [shape: f32[8,256], index: 1, kind: input, shape index: {}]   ;;  %s287_s2 = inlined_call_operand.hbm [shape: f32[1,8,128], index: 2, kind: output, shape index: {}]  }
   0x1   :  { %8 = vsyncpa [#allocation9], 0 }
   0x2   :  { %9 = vsyncpa [#allocation7], 0  ;;  %s258_s9 = smov [#allocation5]   ;;  %s259_s11 = smov [#allocation8]  }
   0x3   :  { %s20_s10 = sshll.u32 %s258_s9, 4  ;;  %s34_s12 = sshll.u32 %s259_s11, 4  ;;  %s21_s10 = int_to_ptr.vmem [resolvable:$true] %s20_s10  ;;  %s35_s12 = int_to_ptr.vmem [resolvable:$true] %s34_s12 }
   0x4   :  { %s200_s13 = scalar_lea.vmem %s21_s10, 256  ;;  %p205_p1 = scmp.lt.s32.totalorder %s21_s10, %s21_s10 }
   0x5   :  { %p201_p0 = scmp.ne.s32.totalorder %s21_s10, %s200_s13  ;;  %p206_p2 = scmp.lt.s32.totalorder %s200_s13, %s200_s13 }
   0x7   :  { %p207_p3 = por %p206_p2, %p205_p1 }
   0x9   :  { %p208_p4 = pnand %p207_p3, %p201_p0 }
   0xb   :  { %211 = shalt.err (!%p208_p4)
}
   0xc   :  { %23 = dma.hbm_to_vmem [thread:$0]  %s285_s0, 256, %s21_s10, [#allocation6]  }
   0xd   :  { %s220_s16 = scalar_lea.vmem %s35_s12, 256  ;;  %p225_p6 = scmp.lt.s32.totalorder %s35_s12, %s35_s12 }
   0xe   :  { %p221_p5 = scmp.ne.s32.totalorder %s35_s12, %s220_s16  ;;  %p226_p7 = scmp.lt.s32.totalorder %s220_s16, %s220_s16 }
  0x10   :  { %p227_p8 = por %p226_p7, %p225_p6 }
  0x12   :  { %p228_p9 = pnand %p227_p8, %p221_p5 }
  0x14   :  { %231 = shalt.err (!%p228_p9)
}
  0x15   :  { %37 = dma.hbm_to_vmem [thread:$0]  %s286_s1, 256, %s35_s12, [#allocation9]  }
  0x16   :  { %252 = dma.done.wait [#allocation6], 256  }
  0x17   :  { %253 = vsyncadd [#allocation6], 4294967040 }
  0x18   :  { %254 = dma.done.wait [#allocation9], 256  }
  0x19   :  { %255 = vsyncadd [#allocation9], 4294967040  ;;  %v56_v0 = vld [vmem:[#allocation5] sm:$0xff]  ;;  %v57_v1 = vld [vmem:[#allocation5 + $0x8] sm:$0xff]  ;;  %v149_v54 = vlaneseq  ;;  %s260_s19 = smov [#allocation10]  }
  0x1a   :  { %v58_v2 = vld [vmem:[#allocation8] sm:$0xff]  ;;  %v59_v3 = vld [vmem:[#allocation8 + $0x8] sm:$0xff]  ;;  %184 = vlog2.f32 %v57_v1  ;;  %v66_v6 = vsub.f32 1.0, %v56_v0  ;;  %v67_v9 = vsub.f32 1.0, %v57_v1  ;;  %s165_s20 = sshll.u32 %s260_s19, 4  ;;  %s166_s20 = int_to_ptr.vmem [resolvable:$true] %s165_s20 }
  0x1b   :  { %v84_v4 = vmul.f32 %v58_v2, %v56_v0  ;;  %v94_v5 = vadd.f32 %v58_v2, %v56_v0  ;;  %v85_v7 = vmul.f32 %v59_v3, %v57_v1  ;;  %186 = vlog2.f32 %v56_v0  ;;  %s232_s22 = scalar_lea.vmem %s166_s20, 128  ;;  %p237_p11 = scmp.lt.s32.totalorder %s166_s20, %s166_s20 }
  0x1c   :  { %v95_v8 = vadd.f32 %v59_v3, %v57_v1  ;;  %188 = vlog2.f32 %v66_v6  ;;  %v150_v55 = vshrl.u32 %v149_v54, 7  ;;  %p233_p10 = scmp.ne.s32.totalorder %s166_s20, %s232_s22  ;;  %p238_p12 = scmp.lt.s32.totalorder %s232_s22, %s232_s22 }
  0x1d   :  { %v115_v10 = vadd.f32 %v85_v7, %v84_v4  ;;  %190 = vlog2.f32 %v67_v9 }
  0x1e   :  { %v127_v11 = vadd.f32 %v95_v8, %v94_v5  ;;  %vm152_vm0 = vcmp.eq.s32.totalorder %v150_v55, 1  ;;  %vm151_vm1 = vcmp.eq.s32.totalorder %v150_v55, 0  ;;  %p239_p13 = por %p238_p12, %p237_p11 }
  0x1f   :  { %116 = vadd.xlane.f32.xlu0 %v115_v10 }
  0x20   :  { %p240_p0 = pnand %p239_p13, %p233_p10 }
  0x23   :  { %128 = vadd.xlane.f32.xlu0 %v127_v11 }
  0x27   :  { %v185_v12 = vpop.eup %184 }
  0x28   :  { %v187_v13 = vpop.eup %186  ;;  %v63_v14 = vmul.f32 0.6931472, %v185_v12 }
  0x29   :  { %v189_v15 = vpop.eup %188  ;;  %v61_v16 = vmul.f32 0.6931472, %v187_v13 }
  0x2a   :  { %v191_v17 = vpop.eup %190  ;;  %v69_v18 = vmul.f32 0.6931472, %v189_v15  ;;  %v65_v20 = vmax.f32 %v63_v14, -100.0 }
  0x2b   :  { %v64_v19 = vmax.f32 %v61_v16, -100.0  ;;  %v71_v21 = vmul.f32 0.6931472, %v191_v17 }
  0x2c   :  { %v72_v22 = vmax.f32 %v69_v18, -100.0 }
  0x2d   :  { %v73_v23 = vmax.f32 %v71_v21, -100.0 }
  0x2e   :  { %v74_v24 = vsub.f32 %v64_v19, %v72_v22 }
  0x2f   :  { %v75_v25 = vsub.f32 %v65_v20, %v73_v23 }
  0x30   :  { %v76_v26 = vmul.f32 %v74_v24, %v58_v2 }
  0x31   :  { %v77_v27 = vmul.f32 %v75_v25, %v59_v3 }
  0x32   :  { %v78_v28 = vadd.f32 %v76_v26, %v72_v22 }
  0x33   :  { %v79_v29 = vadd.f32 %v77_v27, %v73_v23 }
  0x34   :  { %v80_v30 = vsub.f32 0.0, %v78_v28 }
  0x35   :  { %v81_v31 = vsub.f32 0.0, %v79_v29 }
  0x37   :  { %v139_v32 = vadd.f32 %v81_v31, %v80_v30 }
  0x39   :  { %140 = vadd.xlane.f32.xlu1 %v139_v32 }
  0xa8   :  { %v117_v33 = vpop.xlane.xlu0 %116 }
  0xa9   :  { %v118_v34 = vrot.slane %v117_v33, 4 }
  0xab   :  { %v119_v35 = vadd.f32 %v118_v34, %v117_v33 }
  0xac   :  { %v129_v36 = vpop.xlane.xlu0 %128 }
  0xad   :  { %v120_v37 = vrot.slane %v119_v35, 2  ;;  %v130_v38 = vrot.slane %v129_v36, 4 }
  0xaf   :  { %v131_v39 = vadd.f32 %v130_v38, %v129_v36  ;;  %v121_v40 = vadd.f32 %v120_v37, %v119_v35 }
  0xb1   :  { %v132_v41 = vrot.slane %v131_v39, 2  ;;  %v122_v42 = vrot.slane %v121_v40, 1 }
  0xb3   :  { %v133_v43 = vadd.f32 %v132_v41, %v131_v39  ;;  %v123_v44 = vadd.f32 %v122_v42, %v121_v40 }
  0xb5   :  { %175 = vpush %v123_v44  ;;  %v134_v45 = vrot.slane %v133_v43, 1 }
  0xb7   :  { %v135_v46 = vadd.f32 %v134_v45, %v133_v43 }
  0xb9   :  { %177 = vpush %v135_v46 }
  0xc2   :  { %v141_v47 = vpop.xlane.xlu1 %140 }
  0xc3   :  { %v142_v48 = vrot.slane %v141_v47, 4 }
  0xc5   :  { %v143_v49 = vadd.f32 %v142_v48, %v141_v47 }
  0xc7   :  { %v144_v50 = vrot.slane %v143_v49, 2 }
  0xc9   :  { %v145_v51 = vadd.f32 %v144_v50, %v143_v49 }
  0xcb   :  { %v146_v52 = vrot.slane %v145_v51, 1 }
  0xcd   :  { %v147_v53 = vadd.f32 %v146_v52, %v145_v51 }
  0xcf   :  { %179 = vpush %v147_v53 }
  0xe6   :  { %s176_s0 = spop %175 }
  0xe7   :  { %v156_v58 = vstv %s176_s0 }
  0xea   :  { %s178_s1 = spop %177 }
  0xeb   :  { %v153_v56 = vstv %s178_s1 }
 0x100   :  { %s180_s21 = spop %179 }
 0x101   :  { %v154_v57 = vstv %s180_s21 }
 0x102   :  { %v155_v59 = vsel %vm152_vm0, %v153_v56, %v154_v57 }
 0x103   :  { %v157_v60 = vsel %vm151_vm1, %v156_v58, %v155_v59 }
 0x104   :  { %158 = vst [vmem:[#allocation10] sm:$0xff] %v157_v60 }
 0x105   :  { %243 = shalt.err (!%p240_p0)
}
 0x106   :  { %168 = dma.vmem_to_hbm [thread:$0]  %s166_s20, 128, %s287_s2, [#allocation7]  }
 0x107   :  { %256 = dma.done.wait [#allocation7], 128  }
 0x108   :  { %257 = vsyncadd [#allocation7], 4294967168 }
 0x109   :  { %172 = vsyncpa [#allocation6], 1 }
 0x10a   :  { %173 = vsyncpa [#allocation9], 1 }
 0x10b   :  { %174 = vsyncpa [#allocation7], 1 }

</bundles_post_ra>
